<compile_context>
chip_gen: v6e
topology: v6e:2x2x1
jax: 0.10.0
libtpu: 0.0.40
codegen_flags: <defaults>
</compile_context>

<pallas_src>
import functools

import jax
import jax.numpy as jnp
from jax.experimental import pallas as pl
from jax.experimental.pallas import tpu as pltpu

_LANE = 128
_SUBLANE = 8


def _round_up(x, m):
    return ((x + m - 1) // m) * m


def _identifiable_linear_kernel(x_ref, w_ref, b_ref, o_ref):
    # x_ref: (TM, in_features)      -- one row tile of the input
    # w_ref: (in_features, K_pad)   -- pre-transposed padded weight, resident
    # b_ref: (1, K_pad)             -- padded bias, resident
    # o_ref: (TM, K_pad)            -- lane-dense output tile
    acc = jnp.dot(x_ref[...], w_ref[...], preferred_element_type=jnp.float32)
    o_ref[...] = (acc + b_ref[...]).astype(o_ref.dtype)


def prepare_identifiable_linear_params(weight, bias, out_features,
                                       dtype=jnp.float32):
    """One-time parameter prep (do NOT call per forward pass).

    Pads the (k_eff, in_features) PyTorch-layout weight with zero output
    columns up to a multiple of 128 and transposes it to (in_features, k_pad),
    so the kernel's MXU operand is already in its natural (K, N) layout.
    The zero columns are the identifiability zero class.
    """
    k_eff, in_features = weight.shape
    out_cols = 1 if out_features == 1 else out_features
    k_pad = max(_LANE, _round_up(out_cols, _LANE))

    w_t = jnp.zeros((in_features, k_pad), dtype=dtype)
    w_t = w_t.at[:, :k_eff].set(jnp.asarray(weight, dtype=dtype).T)
    b_row = jnp.zeros((1, k_pad), dtype=dtype)
    if bias is not None:
        b_row = b_row.at[0, :k_eff].set(jnp.asarray(bias, dtype=dtype))
    return w_t, b_row


@functools.partial(jax.jit, static_argnames=("out_features",))
def identifiable_linear_prepared(x, w_t, b_row, out_features):
    """Forward pass given pre-padded/transposed params from prepare_...().

    Args:
      x:      (N, in_features) float32
      w_t:    (in_features, k_pad) float32, from prepare_identifiable_linear_params
      b_row:  (1, k_pad) float32
      out_features: int (static) number of classes K
    Returns:
      (N, out_features) with an all-zero last column (or (N, 1) if K == 1).
    """
    n, in_features = x.shape
    k_pad = w_t.shape[1]
    out_cols = 1 if out_features == 1 else out_features
    itemsize = jnp.dtype(x.dtype).itemsize

    # --- VMEM-budget-aware row tile -----------------------------------------
    # Buffer plan: single-buffered weight + bias, double-buffered x and out
    # tiles.  Keep the total under ~40 MiB so it fits comfortably on v7x
    # (64 MiB physical per TC) while staying large enough to hide HBM DMAs.
    vmem_budget = 40 << 20
    weight_bytes = in_features * k_pad * itemsize
    bias_bytes = k_pad * itemsize
    per_row_bytes = 2 * (in_features + k_pad) * itemsize  # double-buffered x+out
    avail = vmem_budget - weight_bytes - bias_bytes
    tm_budget = avail // per_row_bytes if avail > 0 else _SUBLANE
    tm = min(512, int(tm_budget), _round_up(n, _SUBLANE))
    tm = max(_SUBLANE, (tm // _SUBLANE) * _SUBLANE)

    # No x padding: Pallas clips the partial last block; garbage rows only
    # affect output rows >= n, which are clipped on store.
    grid = (pl.cdiv(n, tm),)

    needed_vmem = weight_bytes + bias_bytes + 2 * tm * (in_features + k_pad) * itemsize
    vmem_limit = int(max(32 << 20, min(needed_vmem + (4 << 20), 64 << 20)))

    cost = pl.CostEstimate(
        flops=2 * n * in_features * k_pad,
        transcendentals=0,
        bytes_accessed=itemsize
        * (n * in_features + in_features * k_pad + k_pad + n * k_pad),
    )

    out_full = pl.pallas_call(
        _identifiable_linear_kernel,
        out_shape=jax.ShapeDtypeStruct((n, k_pad), x.dtype),
        grid=grid,
        in_specs=[
            # x: row-tiled, double-buffered (default) for DMA/compute overlap.
            pl.BlockSpec((tm, in_features), lambda i: (i, 0)),
            # weight: resident across the grid -> single fetch, single buffer.
            pl.BlockSpec((in_features, k_pad), lambda i: (0, 0),
                         pipeline_mode=pl.Buffered(1)),
            # bias: resident, single buffer.
            pl.BlockSpec((1, k_pad), lambda i: (0, 0),
                         pipeline_mode=pl.Buffered(1)),
        ],
        out_specs=pl.BlockSpec((tm, k_pad), lambda i: (i, 0)),
        compiler_params=pltpu.CompilerParams(
            dimension_semantics=("parallel",),   # megacore sharding on v7x
            vmem_limit_bytes=vmem_limit,
        ),
        cost_estimate=cost,
    )(x, w_t, b_row)

    # Column out_features-1 is the exactly-zero K-th class (zero-padded weight
    # columns & bias entries); the remaining lane padding is sliced off here.
    out = out_full[:, :out_cols]
    if out_features == 1:
        out = out.reshape(-1, 1)
    return out


def identifiable_linear(x, weight, bias, out_features):
    """Convenience wrapper taking native PyTorch-layout params.

    Prefer prepare_identifiable_linear_params(...) once +
    identifiable_linear_prepared(...) per step to avoid re-padding the weight
    on every forward pass.
    """
    w_t, b_row = prepare_identifiable_linear_params(
        weight, bias, out_features, dtype=x.dtype)
    return identifiable_linear_prepared(x, w_t, b_row, out_features)


if __name__ == "__main__":
    # Small shapes consistent with the module: N=8 rows, in_features=32,
    # out_features=8 (so the underlying linear has 7 columns).
    N, IN_FEATURES, OUT_FEATURES = 8, 32, 8
    k_eff = max(OUT_FEATURES - 1, 1)

    key = jax.random.PRNGKey(0)
    kx, kw, kb = jax.random.split(key, 3)

    # Deterministic parameter init (mimics nn.Linear's uniform(-1/sqrt(in), 1/sqrt(in))).
    bound = 1.0 / jnp.sqrt(jnp.float32(IN_FEATURES))
    weight = jax.random.uniform(
        kw, (k_eff, IN_FEATURES), dtype=jnp.float32, minval=-bound, maxval=bound
    )
    bias = jax.random.uniform(
        kb, (k_eff,), dtype=jnp.float32, minval=-bound, maxval=bound
    )
    x = jax.random.normal(kx, (N, IN_FEATURES), dtype=jnp.float32)

    # One-time parameter prep (hoisted out of the per-call path), then forward.
    w_t, b_row = prepare_identifiable_linear_params(weight, bias, OUT_FEATURES)
    out = identifiable_linear_prepared(x, w_t, b_row, OUT_FEATURES)
    out = jax.block_until_ready(out)

    # Reference of the PyTorch forward.
    ref = jnp.concatenate(
        [x @ weight.T + bias, jnp.zeros((N, 1), dtype=x.dtype)], axis=1
    )
    assert out.shape == (N, OUT_FEATURES)
    assert jnp.allclose(out, ref, atol=1e-5, rtol=1e-5)
    assert jnp.all(out[:, -1] == 0.0)

    # out_features == 1 branch.
    w1_t, b1_row = prepare_identifiable_linear_params(weight[:1], bias[:1], 1)
    out1 = jax.block_until_ready(identifiable_linear_prepared(x, w1_t, b1_row, 1))
    ref1 = (x @ weight[:1].T + bias[:1]).reshape(-1, 1)
    assert out1.shape == (N, 1)
    assert jnp.allclose(out1, ref1, atol=1e-5, rtol=1e-5)

    # Odd shapes (exercise partial-last-block clipping + lane-padding slice).
    N2, IN2, OUT2 = 50, 96, 5
    k2 = OUT2 - 1
    kx2, kw2, kb2 = jax.random.split(jax.random.PRNGKey(1), 3)
    b2 = 1.0 / jnp.sqrt(jnp.float32(IN2))
    w2 = jax.random.uniform(kw2, (k2, IN2), jnp.float32, minval=-b2, maxval=b2)
    bb2 = jax.random.uniform(kb2, (k2,), jnp.float32, minval=-b2, maxval=b2)
    x2 = jax.random.normal(kx2, (N2, IN2), dtype=jnp.float32)
    out2 = jax.block_until_ready(identifiable_linear(x2, w2, bb2, OUT2))
    ref2 = jnp.concatenate(
        [x2 @ w2.T + bb2, jnp.zeros((N2, 1), dtype=x2.dtype)], axis=1
    )
    assert out2.shape == (N2, OUT2)
    assert jnp.allclose(out2, ref2, atol=1e-5, rtol=1e-5)
    assert jnp.all(out2[:, -1] == 0.0)

    print("KERNEL_OK")
</pallas_src>

<mosaic_0001>
module attributes {stable_mosaic.version = 11 : i64} {
  func.func @_identifiable_linear_kernel(%arg0: i32, %arg1: memref<8x32xf32, #tpu.memory_space<vmem>>, %arg2: memref<32x128xf32, #tpu.memory_space<vmem>>, %arg3: memref<1x128xf32, #tpu.memory_space<vmem>>, %arg4: memref<8x128xf32, #tpu.memory_space<vmem>>) attributes {dimension_semantics = [#tpu.dimension_semantics<parallel>], iteration_bounds = array<i64: 1>, scalar_prefetch = 0 : i64, scratch_operands = 0 : i64, tpu.core_type = #tpu.core_type<tc>, window_params = [{transform_indices = @transform_0, window_bounds = array<i64: 8, 32>}, {pipeline_mode = #tpu.pipeline_mode<synchronous>, transform_indices = @transform_1, window_bounds = array<i64: 32, 128>}, {pipeline_mode = #tpu.pipeline_mode<synchronous>, transform_indices = @transform_2, window_bounds = array<i64: 1, 128>}, {transform_indices = @transform_3, window_bounds = array<i64: 8, 128>}]} {
    %c0 = arith.constant 0 : index
    %c0_0 = arith.constant 0 : index
    %0 = vector.load %arg1[%c0, %c0_0] : memref<8x32xf32, #tpu.memory_space<vmem>>, vector<8x32xf32>
    %c0_1 = arith.constant 0 : index
    %c0_2 = arith.constant 0 : index
    %1 = vector.load %arg2[%c0_1, %c0_2] : memref<32x128xf32, #tpu.memory_space<vmem>>, vector<32x128xf32>
    %cst = arith.constant dense<0.000000e+00> : vector<8x128xf32>
    %2 = tpu.matmul %0, %1, %cst {dimension_numbers = #tpu.dot_dimension_numbers<[1], [0], [0], [1], [0, 0, 1, 1], [], []>} : vector<8x32xf32>, vector<32x128xf32>, vector<8x128xf32> -> vector<8x128xf32>
    %c0_3 = arith.constant 0 : index
    %c0_4 = arith.constant 0 : index
    %3 = vector.load %arg3[%c0_3, %c0_4] : memref<1x128xf32, #tpu.memory_space<vmem>>, vector<1x128xf32>
    %4 = vector.broadcast %3 : vector<1x128xf32> to vector<8x128xf32>
    %5 = arith.addf %2, %4 : vector<8x128xf32>
    %c0_5 = arith.constant 0 : index
    %c0_6 = arith.constant 0 : index
    %6 = vector.load %arg4[%c0_5, %c0_6] : memref<8x128xf32, #tpu.memory_space<vmem>>, vector<8x128xf32>
    tpu.vector_store %arg4[%c0_5, %c0_6], %5 {strides = array<i32>} : memref<8x128xf32, #tpu.memory_space<vmem>>, vector<8x128xf32>,
    return
  }
  func.func @transform_0(%arg0: i32) -> (i32, i32) {
    %c0_i32 = arith.constant 0 : i32
    %c0_i32_0 = arith.constant 0 : i32
    return %arg0, %c0_i32 : i32, i32
  }
  func.func @transform_1(%arg0: i32) -> (i32, i32) {
    %c0_i32 = arith.constant 0 : i32
    %c0_i32_0 = arith.constant 0 : i32
    %c0_i32_1 = arith.constant 0 : i32
    return %c0_i32, %c0_i32_0 : i32, i32
  }
  func.func @transform_2(%arg0: i32) -> (i32, i32) {
    %c0_i32 = arith.constant 0 : i32
    %c0_i32_0 = arith.constant 0 : i32
    %c0_i32_1 = arith.constant 0 : i32
    return %c0_i32, %c0_i32_0 : i32, i32
  }
  func.func @transform_3(%arg0: i32) -> (i32, i32) {
    %c0_i32 = arith.constant 0 : i32
    %c0_i32_0 = arith.constant 0 : i32
    return %arg0, %c0_i32 : i32, i32
  }
}

</mosaic_0001>

<bundles_post_ra>
// kernel: identifiable_linear_prepared.1
= control target key start
LH: loop header
LB: loop body
LE: loop exit
PB: predicated region body
PF: predicated region fallthrough
CT: control target
= control target key end

     0   :  { %8 = vsyncpa [#allocation3], 0  ;;  %s274_s0 = inlined_call_operand.hbm [shape: f32[8,32], index: 0, kind: input, shape index: {}]   ;;  %s275_s1 = inlined_call_operand.hbm [shape: f32[32,128], index: 1, kind: input, shape index: {}]   ;;  %s276_s2 = inlined_call_operand.vmem [shape: f32[1,128], index: 2, kind: input, shape index: {}]   ;;  %s277_s3 = inlined_call_operand.hbm [shape: f32[8,128], index: 3, kind: output, shape index: {}]  }
   0x1   :  { %9 = vsyncpa [#allocation6], 0 }
   0x2   :  { %10 = vsyncpa [#allocation4], 0  ;;  %s235_s12 = smov [#allocation2]   ;;  %s236_s14 = smov [#allocation5]  }
   0x3   :  { %s17_s13 = sshll.u32 %s235_s12, 4  ;;  %s26_s15 = sshll.u32 %s236_s14, 4  ;;  %s18_s13 = int_to_ptr.vmem [resolvable:$true] %s17_s13  ;;  %s27_s15 = int_to_ptr.vmem [resolvable:$true] %s26_s15 }
   0x4   :  { %s177_s16 = scalar_lea.vmem %s18_s13, 128  ;;  %p182_p1 = scmp.lt.s32.totalorder %s18_s13, %s18_s13 }
   0x5   :  { %p178_p0 = scmp.ne.s32.totalorder %s18_s13, %s177_s16  ;;  %p183_p2 = scmp.lt.s32.totalorder %s177_s16, %s177_s16 }
   0x7   :  { %p184_p3 = por %p183_p2, %p182_p1 }
   0x9   :  { %p185_p4 = pnand %p184_p3, %p178_p0 }
   0xb   :  { %188 = shalt.err (!%p185_p4)
}
   0xc   :  { %20 = dma.hbm_to_vmem [thread:$0]  %s274_s0, 128, %s18_s13, [#allocation3]  }
   0xd   :  { %s197_s19 = scalar_lea.vmem %s27_s15, 512  ;;  %p202_p6 = scmp.lt.s32.totalorder %s27_s15, %s27_s15 }
   0xe   :  { %p198_p5 = scmp.ne.s32.totalorder %s27_s15, %s197_s19  ;;  %p203_p7 = scmp.lt.s32.totalorder %s197_s19, %s197_s19 }
  0x10   :  { %p204_p8 = por %p203_p7, %p202_p6 }
  0x12   :  { %p205_p9 = pnand %p204_p8, %p198_p5 }
  0x14   :  { %208 = shalt.err (!%p205_p9)
}
  0x15   :  { %s237_s20 = smov 128   ;;  %s238_s21 = smov 8  }
  0x16   :  { %32 = dma.hbm_to_vmem [thread:$0]  %s275_s1, 512, %s27_s15, [#allocation6], %s237_s20, %s237_s20, %s238_s21  }
  0x17   :  { %229 = dma.done.wait [#allocation3], 128  }
  0x18   :  { %230 = vsyncadd [#allocation3], 4294967168 }
  0x19   :  { %231 = dma.done.wait [#allocation6], 512  }
  0x1a   :  { %232 = vsyncadd [#allocation6], 4294966784  ;;  %v239_v0 = vmov 0.0   ;;  %vm240_vm0 = vmmov 0   ;;  %v45_v1 = vld [vmem:[#allocation5 + $0x18] sm:$0xff]  ;;  %v44_v2 = vld [vmem:[#allocation5 + $0x10] sm:$0xff] }
  0x1b   :  { %151 = vmatprep.subr.mxu0 %v239_v0  ;;  %159 = vmatprep.mubr.msk.f32.mxu0 %vm240_vm0, %v239_v0  ;;  %v43_v3 = vld [vmem:[#allocation5 + $0x8] sm:$0xff]  ;;  %v42_v4 = vld [vmem:[#allocation5] sm:$0xff]  ;;  %v41_v5 = vld [vmem:[#allocation2] sm:$0xff]  ;;  %vm53_vm1 = vcmask 261120   ;;  %s241_s24 = smov [#allocation7]  }
  0x1c   :  { %152 = vmatpush3.msra.mxu0 %v45_v1  ;;  %v144_v6 = vld [vmem:[%s276_s2] ss:$0 sm:$0xff]  ;;  %s134_s25 = sshll.u32 %s241_s24, 4  ;;  %s135_s25 = int_to_ptr.vmem [resolvable:$true] %s134_s25 }
  0x1d   :  { %153 = vmatprep.subr.mxu0 %v239_v0  ;;  %s209_s26 = scalar_lea.vmem %s135_s25, 128  ;;  %p214_p11 = scmp.lt.s32.totalorder %s135_s25, %s135_s25 }
  0x1e   :  { %154 = vmatpush3.msra.mxu0 %v44_v2  ;;  %p210_p10 = scmp.ne.s32.totalorder %s135_s25, %s209_s26  ;;  %p215_p12 = scmp.lt.s32.totalorder %s209_s26, %s209_s26 }
  0x1f   :  { %155 = vmatprep.subr.mxu0 %v239_v0 }
  0x20   :  { %156 = vmatpush3.msra.mxu0 %v43_v3  ;;  %p216_p13 = por %p215_p12, %p214_p11 }
  0x21   :  { %157 = vmatprep.subr.mxu0 %v239_v0 }
  0x22   :  { %158 = vmatpush3.msra.mxu0 %v42_v4  ;;  %p217_p0 = pnand %p216_p13, %p210_p10 }
  0x23   :  { %160 = vmatmul.mubr.msk.f32.vlgmr.msra.gmra.mxu0 %vm53_vm1, %v41_v5 }
  0xe3   :  { %v123_v7 = vpop.f32.mrf.mxu0 }
  0xe4   :  { %v124_v8 = vadd.f32 %v144_v6, %v123_v7 }
  0xe5   :  { %v161_v9 = vpop.f32.mrf.mxu0 }
  0xe6   :  { %127 = vst [vmem:[#allocation7] sm:$0xff] %v124_v8 }
  0xe7   :  { %220 = shalt.err (!%p217_p0)
}
  0xe8   :  { %137 = dma.vmem_to_hbm [thread:$0]  %s135_s25, 128, %s277_s3, [#allocation4]  }
  0xe9   :  { %233 = dma.done.wait [#allocation4], 128  }
  0xea   :  { %234 = vsyncadd [#allocation4], 4294967168 }
  0xeb   :  { %141 = vsyncpa [#allocation3], 1 }
  0xec   :  { %142 = vsyncpa [#allocation6], 1 }
  0xed   :  { %143 = vsyncpa [#allocation4], 1 }

</bundles_post_ra>
